<compile_context>
chip_gen: v7x
topology: tpu7x:2x2x1
jax: 0.10.0
libtpu: 0.0.40
codegen_flags: <defaults>
</compile_context>

<pallas_src>
import jax
import jax.numpy as jnp
from jax.experimental import pallas as pl
from jax.experimental.pallas import tpu as pltpu

_MAX_BATCH_TILE = 2048      # rows per grid step (multiple of 16)
_TWO_STEP_MIN_BATCH = 512   # above this, keep >=2 grid steps (v7x megacore)
_PALLAS_MIN_BATCH = 2048    # below this, plain-JAX fallback (launch overhead)


def _round_up(x, m):
    return ((x + m - 1) // m) * m


def _fuse_kernel(f1_ref, f2_ref, w1_ref, w2_ref, b_ref, o_ref):
    # Fused concat + linear for one batch tile:
    #   out = f1 @ wt1 + f2 @ wt2 + b
    # Inputs are read straight from HBM in their native dtype and cast to the
    # compute dtype (bf16) in-register; accumulation and bias add stay in f32,
    # single cast at the (lane-exact, unpadded) store.
    cdt = w1_ref.dtype
    acc = jnp.dot(f1_ref[...].astype(cdt), w1_ref[...],
                  preferred_element_type=jnp.float32)
    acc = acc + jnp.dot(f2_ref[...].astype(cdt), w2_ref[...],
                        preferred_element_type=jnp.float32)
    acc = acc + b_ref[...]                       # (1, D_out) f32, broadcasts
    o_ref[...] = acc.astype(o_ref.dtype)


def prepare_fuse_net_params(weight, bias, d1, compute_dtype=jnp.bfloat16):
    """One-time (module-init) parameter prep, hoisted out of the hot path.

    weight: (D_out, D_in) torch nn.Linear layout, with D_in = D1 + D2.
    bias  : (D_out,)
    d1    : feature width of feat1 (split point of the fused concat).
    Returns (wt1, wt2, b2d):
      wt1: (D1, D_out) in compute_dtype
      wt2: (D2, D_out) in compute_dtype
      b2d: (1, D_out) float32 (epilogue stays f32 on all chip generations)
    Pass compute_dtype=jnp.float32 for exact torch-f32 numerics (at the cost
    of 2x input-side weight/activation MXU operand width).
    """
    d_out, d_in = weight.shape
    assert 0 < d1 < d_in
    wt = weight.T.astype(compute_dtype)          # (D_in, D_out)
    wt1 = wt[:d1]
    wt2 = wt[d1:]
    b2d = bias.astype(jnp.float32).reshape(1, d_out)
    return wt1, wt2, b2d


def fuse_net_forward(feat1, feat2, params, out_dtype=None, use_pallas=None):
    """FuseNet.forward: cat([feat1, feat2], 1) @ W.T + b, fused in one kernel.

    feat1 : (B, D1)
    feat2 : (B, D2)
    params: (wt1, wt2, b2d) from prepare_fuse_net_params
    out_dtype: output dtype (default feat1.dtype; use bf16 to halve the
               dominant output HBM stream when the consumer tolerates it).
    use_pallas: None -> auto (Pallas only when B >= _PALLAS_MIN_BATCH),
                True/False -> force.
    returns (B, D_out) in out_dtype
    """
    wt1, wt2, b2d = params
    b_sz, d1 = feat1.shape
    _, d2 = feat2.shape
    assert wt1.shape[0] == d1 and wt2.shape[0] == d2
    d_out = wt1.shape[1]
    cdt = wt1.dtype
    if out_dtype is None:
        out_dtype = feat1.dtype

    if use_pallas is None:
        use_pallas = b_sz >= _PALLAS_MIN_BATCH

    if not use_pallas:
        # Tiny workload: pallas_call fixed cost dwarfs it and blocks XLA
        # fusion with producers/consumers.  Same numerics as the kernel.
        acc = (jnp.dot(feat1.astype(cdt), wt1, preferred_element_type=jnp.float32)
               + jnp.dot(feat2.astype(cdt), wt2, preferred_element_type=jnp.float32)
               + b2d)
        return acc.astype(out_dtype)

    # Batch tile: big enough to amortize the ~0.35us per-grid-step overhead,
    # but (for mid-size batches) split so the grid keeps >=2 steps and the
    # "parallel" batch axis can be sharded across both v7x TensorCores.
    if b_sz > _MAX_BATCH_TILE:
        tb = _MAX_BATCH_TILE
    elif b_sz >= _TWO_STEP_MIN_BATCH:
        tb = _round_up((b_sz + 1) // 2, 16)
    else:
        tb = b_sz
    grid = (pl.cdiv(b_sz, tb),)

    itemsize = lambda a: jnp.dtype(a.dtype).itemsize
    cost = pl.CostEstimate(
        flops=2 * b_sz * (d1 + d2) * d_out,
        transcendentals=0,
        bytes_accessed=(feat1.size * itemsize(feat1)
                        + feat2.size * itemsize(feat2)
                        + wt1.size * itemsize(wt1)
                        + wt2.size * itemsize(wt2)
                        + b2d.size * itemsize(b2d)
                        + b_sz * d_out * jnp.dtype(out_dtype).itemsize),
    )

    out = pl.pallas_call(
        _fuse_kernel,
        out_shape=jax.ShapeDtypeStruct((b_sz, d_out), out_dtype),
        grid=grid,
        in_specs=[
            pl.BlockSpec((tb, d1), lambda i: (i, 0)),       # feat1 streamed
            pl.BlockSpec((tb, d2), lambda i: (i, 0)),       # feat2 streamed
            pl.BlockSpec((d1, d_out), lambda i: (0, 0)),    # wt1 resident
            pl.BlockSpec((d2, d_out), lambda i: (0, 0)),    # wt2 resident
            pl.BlockSpec((1, d_out), lambda i: (0, 0)),     # bias resident
        ],
        out_specs=pl.BlockSpec((tb, d_out), lambda i: (i, 0)),
        compiler_params=pltpu.CompilerParams(
            # batch rows are independent -> shard across both TCs on v7x
            dimension_semantics=("parallel",),
        ),
        cost_estimate=cost,
    )(feat1, feat2, wt1, wt2, b2d)

    return out


if __name__ == "__main__":
    # Small shapes consistent with the module: in_n_out_sizes = [64, 32].
    B, D1, D2, D_OUT = 8, 32, 32, 32

    key = jax.random.PRNGKey(0)
    k1, k2, kw, kb = jax.random.split(key, 4)
    feat1 = jax.random.normal(k1, (B, D1), dtype=jnp.float32)
    feat2 = jax.random.normal(k2, (B, D2), dtype=jnp.float32)
    # Deterministic synthetic nn.Linear parameters (torch layout: (out, in)).
    weight = jax.random.normal(kw, (D_OUT, D1 + D2), dtype=jnp.float32) * 0.05
    bias = jax.random.normal(kb, (D_OUT,), dtype=jnp.float32) * 0.05

    # One-time parameter prep ("module init"), out of the per-forward path.
    params = prepare_fuse_net_params(weight, bias, D1, compute_dtype=jnp.bfloat16)

    # Force the Pallas path at this small demo size so the kernel is exercised
    # (in production the auto-threshold picks the fallback for tiny batches).
    fwd = jax.jit(lambda f1, f2: fuse_net_forward(f1, f2, params, use_pallas=True))
    out = jax.block_until_ready(fwd(feat1, feat2))
    assert out.shape == (B, D_OUT)
    assert out.dtype == feat1.dtype

    # Fallback path must agree with the kernel (same bf16/f32 numerics).
    fwd_fb = jax.jit(lambda f1, f2: fuse_net_forward(f1, f2, params, use_pallas=False))
    out_fb = jax.block_until_ready(fwd_fb(feat1, feat2))
    assert jnp.allclose(out, out_fb, atol=5e-3, rtol=5e-3)

    # Reference 1: same bf16 input/weight quantization, f32 accumulate
    # (matches the kernel's numerics) -- tight tolerance.
    xq = jnp.concatenate([feat1, feat2], axis=1).astype(jnp.bfloat16).astype(jnp.float32)
    wq = weight.astype(jnp.bfloat16).astype(jnp.float32)
    ref_q = xq @ wq.T + bias
    assert jnp.allclose(out, ref_q, atol=5e-3, rtol=5e-3)

    # Reference 2: pure f32 torch semantics -- bf16-level tolerance.
    ref = jnp.concatenate([feat1, feat2], axis=1) @ weight.T + bias
    assert jnp.allclose(out, ref, atol=3e-2, rtol=3e-2)

    print("KERNEL_OK")
</pallas_src>

<mosaic_0001>
module attributes {stable_mosaic.version = 11 : i64} {
  func.func @_fuse_kernel(%arg0: i32, %arg1: memref<8x32xf32, #tpu.memory_space<vmem>>, %arg2: memref<8x32xf32, #tpu.memory_space<vmem>>, %arg3: memref<32x32xbf16, #tpu.memory_space<vmem>>, %arg4: memref<32x32xbf16, #tpu.memory_space<vmem>>, %arg5: memref<1x32xf32, #tpu.memory_space<vmem>>, %arg6: memref<8x32xf32, #tpu.memory_space<vmem>>) attributes {dimension_semantics = [#tpu.dimension_semantics<parallel>], iteration_bounds = array<i64: 1>, scalar_prefetch = 0 : i64, scratch_operands = 0 : i64, tpu.core_type = #tpu.core_type<tc>, window_params = [{transform_indices = @transform_0, window_bounds = array<i64: 8, 32>}, {transform_indices = @transform_1, window_bounds = array<i64: 8, 32>}, {pipeline_mode = #tpu.pipeline_mode<synchronous>, transform_indices = @transform_2, window_bounds = array<i64: 32, 32>}, {pipeline_mode = #tpu.pipeline_mode<synchronous>, transform_indices = @transform_3, window_bounds = array<i64: 32, 32>}, {pipeline_mode = #tpu.pipeline_mode<synchronous>, transform_indices = @transform_4, window_bounds = array<i64: 1, 32>}, {transform_indices = @transform_5, window_bounds = array<i64: 8, 32>}]} {
    %c0 = arith.constant 0 : index
    %c0_0 = arith.constant 0 : index
    %0 = vector.load %arg1[%c0, %c0_0] : memref<8x32xf32, #tpu.memory_space<vmem>>, vector<8x32xf32>
    %1 = arith.truncf %0 : vector<8x32xf32> to vector<8x32xbf16>
    %c0_1 = arith.constant 0 : index
    %c0_2 = arith.constant 0 : index
    %2 = vector.load %arg3[%c0_1, %c0_2] : memref<32x32xbf16, #tpu.memory_space<vmem>>, vector<32x32xbf16>
    %cst = arith.constant dense<0.000000e+00> : vector<8x32xf32>
    %3 = tpu.matmul %1, %2, %cst {dimension_numbers = #tpu.dot_dimension_numbers<[1], [0], [0], [1], [0, 0, 1, 1], [], []>} : vector<8x32xbf16>, vector<32x32xbf16>, vector<8x32xf32> -> vector<8x32xf32>
    %c0_3 = arith.constant 0 : index
    %c0_4 = arith.constant 0 : index
    %4 = vector.load %arg2[%c0_3, %c0_4] : memref<8x32xf32, #tpu.memory_space<vmem>>, vector<8x32xf32>
    %5 = arith.truncf %4 : vector<8x32xf32> to vector<8x32xbf16>
    %c0_5 = arith.constant 0 : index
    %c0_6 = arith.constant 0 : index
    %6 = vector.load %arg4[%c0_5, %c0_6] : memref<32x32xbf16, #tpu.memory_space<vmem>>, vector<32x32xbf16>
    %cst_7 = arith.constant dense<0.000000e+00> : vector<8x32xf32>
    %7 = tpu.matmul %5, %6, %cst_7 {dimension_numbers = #tpu.dot_dimension_numbers<[1], [0], [0], [1], [0, 0, 1, 1], [], []>} : vector<8x32xbf16>, vector<32x32xbf16>, vector<8x32xf32> -> vector<8x32xf32>
    %8 = arith.addf %3, %7 : vector<8x32xf32>
    %c0_8 = arith.constant 0 : index
    %c0_9 = arith.constant 0 : index
    %9 = vector.load %arg5[%c0_8, %c0_9] : memref<1x32xf32, #tpu.memory_space<vmem>>, vector<1x32xf32>
    %10 = vector.broadcast %9 : vector<1x32xf32> to vector<8x32xf32>
    %11 = arith.addf %8, %10 : vector<8x32xf32>
    %c0_10 = arith.constant 0 : index
    %c0_11 = arith.constant 0 : index
    %12 = vector.load %arg6[%c0_10, %c0_11] : memref<8x32xf32, #tpu.memory_space<vmem>>, vector<8x32xf32>
    tpu.vector_store %arg6[%c0_10, %c0_11], %11 {strides = array<i32>} : memref<8x32xf32, #tpu.memory_space<vmem>>, vector<8x32xf32>,
    return
  }
  func.func @transform_0(%arg0: i32) -> (i32, i32) {
    %c0_i32 = arith.constant 0 : i32
    %c0_i32_0 = arith.constant 0 : i32
    return %arg0, %c0_i32 : i32, i32
  }
  func.func @transform_1(%arg0: i32) -> (i32, i32) {
    %c0_i32 = arith.constant 0 : i32
    %c0_i32_0 = arith.constant 0 : i32
    return %arg0, %c0_i32 : i32, i32
  }
  func.func @transform_2(%arg0: i32) -> (i32, i32) {
    %c0_i32 = arith.constant 0 : i32
    %c0_i32_0 = arith.constant 0 : i32
    %c0_i32_1 = arith.constant 0 : i32
    return %c0_i32, %c0_i32_0 : i32, i32
  }
  func.func @transform_3(%arg0: i32) -> (i32, i32) {
    %c0_i32 = arith.constant 0 : i32
    %c0_i32_0 = arith.constant 0 : i32
    %c0_i32_1 = arith.constant 0 : i32
    return %c0_i32, %c0_i32_0 : i32, i32
  }
  func.func @transform_4(%arg0: i32) -> (i32, i32) {
    %c0_i32 = arith.constant 0 : i32
    %c0_i32_0 = arith.constant 0 : i32
    %c0_i32_1 = arith.constant 0 : i32
    return %c0_i32, %c0_i32_0 : i32, i32
  }
  func.func @transform_5(%arg0: i32) -> (i32, i32) {
    %c0_i32 = arith.constant 0 : i32
    %c0_i32_0 = arith.constant 0 : i32
    return %arg0, %c0_i32 : i32, i32
  }
}

</mosaic_0001>

<bundles_post_ra>
// kernel: _lambda_.1
= control target key start
LH: loop header
LB: loop body
LE: loop exit
PB: predicated region body
PF: predicated region fallthrough
CT: control target
= control target key end

     0   :  { %10 = vsyncpa [#allocation3], 0  ;;  %s440_s0 = inlined_call_operand.hbm [shape: f32[8,32], index: 0, kind: input, shape index: {}]   ;;  %s441_s1 = inlined_call_operand.hbm [shape: f32[8,32], index: 1, kind: input, shape index: {}]   ;;  %s442_s2 = inlined_call_operand.hbm [shape: bf16[32,32], index: 2, kind: input, shape index: {}]   ;;  %s443_s3 = inlined_call_operand.vmem [shape: bf16[32,32], index: 3, kind: input, shape index: {}]   ;;  %s444_s4 = inlined_call_operand.vmem [shape: f32[1,32], index: 4, kind: input, shape index: {}]   ;;  %s445_s5 = inlined_call_operand.hbm [shape: f32[8,32], index: 5, kind: output, shape index: {}]  }
   0x1   :  { %11 = vsyncpa [#allocation6], 0 }
   0x2   :  { %12 = vsyncpa [#allocation4], 0  ;;  %s342_s18 = smov [#allocation5]   ;;  %s343_s20 = smov [#allocation2]  }
   0x3   :  { %s29_s19 = sshll.u32 %s342_s18, 4  ;;  %s19_s21 = sshll.u32 %s343_s20, 4  ;;  %s30_s19 = int_to_ptr.vmem [resolvable:$true] %s29_s19  ;;  %s20_s21 = int_to_ptr.vmem [resolvable:$true] %s19_s21 }
   0x4   :  { %s248_s24 = scalar_lea.hbm %s441_s1, 128 }
   0x5   :  { %p249_p0 = scmp.ne.s32.totalorder %s441_s1, %s248_s24  ;;  %p252_p1 = scmp.lt.u32.totalorder %s248_s24, %s441_s1 }
   0x7   :  { %p254_p2 = pnand %p252_p1, %p249_p0 }
   0x9   :  { %257 = shalt.err (!%p254_p2)
}
   0xa   :  { %s258_s29 = scalar_lea.vmem %s30_s19, 128  ;;  %p263_p4 = scmp.lt.s32.totalorder %s30_s19, %s30_s19 }
   0xb   :  { %p259_p3 = scmp.ne.s32.totalorder %s30_s19, %s258_s29  ;;  %p264_p5 = scmp.lt.s32.totalorder %s258_s29, %s258_s29 }
   0xd   :  { %p265_p6 = por %p264_p5, %p263_p4 }
   0xf   :  { %p266_p7 = pnand %p265_p6, %p259_p3 }
  0x11   :  { %269 = shalt.err (!%p266_p7)
}
  0x12   :  { %32 = dma.hbm_to_vmem [thread:$0]  %s441_s1, 128, %s30_s19, [#allocation6]  }
  0x13   :  { %s270_s9 = scalar_lea.hbm %s440_s0, 128 }
  0x14   :  { %p271_p8 = scmp.ne.s32.totalorder %s440_s0, %s270_s9  ;;  %p274_p9 = scmp.lt.u32.totalorder %s270_s9, %s440_s0 }
  0x16   :  { %p276_p10 = pnand %p274_p9, %p271_p8 }
  0x18   :  { %279 = shalt.err (!%p276_p10)
}
  0x19   :  { %s280_s14 = scalar_lea.vmem %s20_s21, 128  ;;  %p285_p12 = scmp.lt.s32.totalorder %s20_s21, %s20_s21 }
  0x1a   :  { %p281_p11 = scmp.ne.s32.totalorder %s20_s21, %s280_s14  ;;  %p286_p13 = scmp.lt.s32.totalorder %s280_s14, %s280_s14 }
  0x1c   :  { %p287_p0 = por %p286_p13, %p285_p12 }
  0x1e   :  { %p288_p1 = pnand %p287_p0, %p281_p11 }
  0x20   :  { %291 = shalt.err (!%p288_p1)
}
  0x21   :  { %22 = dma.hbm_to_vmem [thread:$0]  %s440_s0, 128, %s20_s21, [#allocation3]  }
  0x22   :  { %s344_s16 = smov [#allocation7]   ;;  %s292_s20 = scalar_lea.hbm %s442_s2, 256 }
  0x23   :  { %s38_s17 = sshll.u32 %s344_s16, 4  ;;  %p293_p2 = scmp.ne.s32.totalorder %s442_s2, %s292_s20  ;;  %s39_s17 = int_to_ptr.vmem [resolvable:$true] %s38_s17 }
  0x24   :  { %p296_p3 = scmp.lt.u32.totalorder %s292_s20, %s442_s2 }
  0x26   :  { %p298_p4 = pnand %p296_p3, %p293_p2 }
  0x28   :  { %301 = shalt.err (!%p298_p4)
}
  0x29   :  { %s302_s26 = scalar_lea.vmem %s39_s17, 256  ;;  %p307_p6 = scmp.lt.s32.totalorder %s39_s17, %s39_s17 }
  0x2a   :  { %p303_p5 = scmp.ne.s32.totalorder %s39_s17, %s302_s26  ;;  %p308_p7 = scmp.lt.s32.totalorder %s302_s26, %s302_s26 }
  0x2c   :  { %p309_p8 = por %p308_p7, %p307_p6 }
  0x2e   :  { %p310_p9 = pnand %p309_p8, %p303_p5 }
  0x30   :  { %313 = shalt.err (!%p310_p9)
}
  0x31   :  { %s345_s0 = smov 64   ;;  %s346_s21 = smov 4  }
  0x32   :  { %44 = dma.hbm_to_vmem [thread:$0]  %s442_s2, 256, %s39_s17, [#allocation6], %s345_s0, %s345_s0, %s346_s21  }
  0x33   :  { %336 = dma.done.wait [#allocation3], 128  }
  0x34   :  { %337 = vsyncadd [#allocation3], 4294967168 }
  0x35   :  { %338 = dma.done.wait [#allocation6], 384  }
  0x36   :  { %339 = vsyncadd [#allocation6], 4294966912  ;;  %v347_v0 = vmov 0.0   ;;  %vm348_vm0 = vmmov 0   ;;  %v244_v1 = vld [vmem:[%s443_s3] sm:$0xff]   ;;  %v245_v2 = vld [vmem:[#allocation7] sm:$0xff]  }
  0x37   :  { %220 = vmatprep.subr.bf16.mxu0 %v347_v0  ;;  %228 = vmatprep.subr.bf16.mxu1 %v347_v0  ;;  %v246_v3 = vld [vmem:[%s443_s3 + $0x8] sm:$0xff]   ;;  %v247_v4 = vld [vmem:[#allocation7 + $0x8] sm:$0xff]   ;;  %v59_v6 = vld [vmem:[#allocation2] sm:$0xff]  ;;  %vm83_vm1 = vcmask 261120   ;;  %s349_s3 = smov [#allocation8]  }
  0x38   :  { %224 = vmatprep.mubr.msk.bf16.mxu0 %vm348_vm0, %v347_v0  ;;  %232 = vmatprep.mubr.msk.bf16.mxu1 %vm348_vm0, %v347_v0  ;;  %v65_v5 = vld [vmem:[#allocation5] sm:$0xff]  ;;  %v60_v8 = vpack.c.bf16 %v59_v6, %v59_v6  ;;  %v213_v11 = vld [vmem:[%s444_s4] ss:$0 sm:$0xff]  ;;  %s197_s9 = sshll.u32 %s349_s3, 4  ;;  %s198_s9 = int_to_ptr.vmem [resolvable:$true] %s197_s9 }
  0x39   :  { %221 = vmatpush3.bf16.msra.mxu0 %v244_v1  ;;  %229 = vmatpush3.bf16.msra.mxu1 %v245_v2  ;;  %v66_v7 = vpack.c.bf16 %v65_v5, %v65_v5  ;;  %s314_s10 = scalar_lea.vmem %s198_s9, 128  ;;  %p319_p11 = scmp.lt.s32.totalorder %s198_s9, %s198_s9 }
  0x3a   :  { %222 = vmatprep.subr.bf16.mxu0 %v347_v0  ;;  %230 = vmatprep.subr.bf16.mxu1 %v347_v0  ;;  %p315_p10 = scmp.ne.s32.totalorder %s198_s9, %s314_s10  ;;  %p320_p12 = scmp.lt.s32.totalorder %s314_s10, %s314_s10 }
  0x3c   :  { %p321_p13 = por %p320_p12, %p319_p11 }
  0x3d   :  { %223 = vmatpush3.bf16.msra.mxu0 %v246_v3  ;;  %231 = vmatpush3.bf16.msra.mxu1 %v247_v4 }
  0x3e   :  { %p322_p0 = pnand %p321_p13, %p315_p10 }
  0x40   :  { %225 = vmatmul.mubr.msk.bf16.vlgmr.msra.gmra.mrb[0].mxu0 %vm83_vm1, %v66_v7  ;;  %233 = vmatmul.mubr.msk.bf16.vlgmr.msra.gmra.mrb[0].mxu1 %vm83_vm1, %v60_v8 }
 0x113   :  { %v121_v9 = vpop.f32.mrb[0].mxu0  ;;  %v176_v10 = vpop.f32.mrb[0].mxu1 }
 0x114   :  { %v226_v12 = vpop.f32.mrb[1].mxu0  ;;  %v177_v13 = vadd.f32 %v176_v10, %v121_v9  ;;  %v234_v14 = vpop.f32.mrb[1].mxu1 }
 0x115   :  { %v124_v15 = vpop.f32.mrb[2].mxu0  ;;  %v179_v16 = vpop.f32.mrb[2].mxu1 }
 0x116   :  { %v227_v17 = vpop.f32.mrb[3].mxu0  ;;  %v189_v18 = vadd.f32 %v213_v11, %v177_v13  ;;  %v235_v19 = vpop.f32.mrb[3].mxu1 }
 0x118   :  { %190 = vst.msk [vmem:[#allocation8] sm:$0xff] %vm83_vm1, %v189_v18 }
 0x119   :  { %325 = shalt.err (!%p322_p0)
}
 0x11a   :  { %s326_s12 = scalar_lea.hbm %s445_s5, 128 }
 0x11b   :  { %p327_p1 = scmp.ne.s32.totalorder %s445_s5, %s326_s12  ;;  %p330_p2 = scmp.lt.u32.totalorder %s326_s12, %s445_s5 }
 0x11d   :  { %p332_p3 = pnand %p330_p2, %p327_p1 }
 0x11f   :  { %335 = shalt.err (!%p332_p3)
}
 0x120   :  { %200 = dma.vmem_to_hbm [thread:$0]  %s198_s9, 128, %s445_s5, [#allocation4]  }
 0x121   :  { %340 = dma.done.wait [#allocation4], 128  }
 0x122   :  { %341 = vsyncadd [#allocation4], 4294967168 }
 0x123   :  { %204 = vsyncpa [#allocation3], 1 }
 0x124   :  { %205 = vsyncpa [#allocation6], 1 }
 0x125   :  { %206 = vsyncpa [#allocation4], 1 }

</bundles_post_ra>
